<compile_context>
chip_gen: v6e
topology: v6e:2x2x1
jax: 0.10.0
libtpu: 0.0.40
codegen_flags: <defaults>
</compile_context>

<pallas_src>
import math

import numpy as np

import jax
import jax.numpy as jnp
from jax.experimental import pallas as pl
from jax.experimental.pallas import tpu as pltpu

_BIG = 1e30  # stand-in for +/- inf clamp bounds (no-op clamp); compute is f32


# ----------------------------- Pallas kernel --------------------------------
def _normalizer_kernel(x_ref, scale_ref, bias_ref, lo_ref, hi_ref, o_ref):
    # Pure elementwise; params broadcast against the x block.
    y = x_ref[...] * scale_ref[...] - bias_ref[...]
    y = jnp.minimum(jnp.maximum(y, lo_ref[...]), hi_ref[...])
    o_ref[...] = y.astype(o_ref.dtype)


def _pick_batch_tile(B):
    """Largest power-of-two tile (<=4096 rows) that exactly divides B."""
    if B % 8 != 0:
        return B  # tiny / odd batches: single full block
    for tb in (4096, 2048, 1024, 512, 256, 128, 64, 32, 16, 8):
        if tb <= B and B % tb == 0:
            return tb
    return B


# ------------------------------- Wrapper -------------------------------------
class LowLevelNormalizerPallas:
    def __init__(self, num_scan_stack, range_max, n_angles, max_goal_dist,
                 linvel_range, rotvel_range, reward_param_range):
        self.num_scan_stack = num_scan_stack
        self.range_max = float(range_max)
        self.n_angles = n_angles
        self.max_goal_dist = float(max_goal_dist)
        self.linvel_range = linvel_range
        self.rotvel_range = rotvel_range
        self.reward_param_range = reward_param_range

        n_scan = num_scan_stack * n_angles
        D = n_scan + 9
        self.D = D

        # ---- per-column raw constants (clip bounds + affine) ----
        cmin = np.full(D, -_BIG, np.float64)
        cmax = np.full(D, _BIG, np.float64)
        lo = np.zeros(D, np.float64)
        inv = np.ones(D, np.float64)
        shift = np.zeros(D, np.float64)

        cmin[:n_scan] = 0.0
        cmax[:n_scan] = self.range_max
        inv[:n_scan] = 1.0 / self.range_max
        shift[:n_scan] = 0.5

        rpr = reward_param_range
        crash_lo = rpr['crash'][0][0]
        crash_hi = rpr['crash'][0][1]

        def set_col(neg_idx, lo_v, denom):
            j = D + neg_idx
            lo[j] = lo_v
            inv[j] = 1.0 / denom
            shift[j] = 0.5

        set_col(-9, 0.0, self.max_goal_dist)
        # -8: passthrough (lo=0, inv=1, shift=0, no clamp) -- already set.
        set_col(-7, linvel_range[0], linvel_range[1] - linvel_range[0])
        set_col(-6, rotvel_range[0], rotvel_range[1] - rotvel_range[0])
        set_col(-5, crash_lo, crash_hi - crash_lo)
        # -4..-1: denominators use X_hi - crash_lo, faithfully reproducing the
        # reference implementation (including its crash_lo mixing).
        for neg_idx, name in ((-4, 'progress'), (-3, 'forward'),
                              (-2, 'rotation'), (-1, 'discomfort')):
            set_col(neg_idx, rpr[name][0][0], rpr[name][0][1] - crash_lo)

        # ---- fold into scale / bias / clamp-after-affine bounds ----
        scale = inv
        bias = lo * inv + shift
        lo2 = np.minimum(cmin * scale, cmax * scale) - bias
        hi2 = np.maximum(cmin * scale, cmax * scale) - bias

        f32 = jnp.float32
        self._scale_row = jnp.asarray(scale.reshape(1, D), f32)
        self._bias_row = jnp.asarray(bias.reshape(1, D), f32)
        self._lo_row = jnp.asarray(lo2.reshape(1, D), f32)
        self._hi_row = jnp.asarray(hi2.reshape(1, D), f32)

        # ---- lane-dense (flat) periodic param tile ----
        # Flat element p maps to column p % D; the pattern repeats every
        # `period` 128-lane rows, and the tile must also be a multiple of 8
        # sublanes -> tile rows = lcm(period, 8).
        g = math.gcd(D, 128)
        period = D // g
        tbf = period * (8 // math.gcd(period, 8))  # lcm(period, 8)
        self._flat_tile_rows = tbf
        cols = (np.arange(tbf * 128) % D).reshape(tbf, 128)
        self._scale_flat = jnp.asarray(scale[cols], f32)
        self._bias_flat = jnp.asarray(bias[cols], f32)
        self._lo_flat = jnp.asarray(lo2[cols], f32)
        self._hi_flat = jnp.asarray(hi2[cols], f32)

    # -------------------------- row-tiled path -------------------------------
    def __call__(self, obs):
        """Normalize obs of shape (B, D), tiling the batch (sublane) axis.

        Note: for tiny batches (a handful of rows) a plain fused-XLA
        elementwise expression would beat the pallas_call overhead; this class
        always uses the kernel so the Pallas path is exercised.
        """
        B, D = obs.shape
        assert D == self.D
        TB = _pick_batch_tile(B)
        grid = (B // TB,)
        param_spec = pl.BlockSpec((1, D), lambda i: (0, 0))
        return pl.pallas_call(
            _normalizer_kernel,
            out_shape=jax.ShapeDtypeStruct((B, D), obs.dtype),
            grid=grid,
            in_specs=[
                pl.BlockSpec((TB, D), lambda i: (i, 0)),
                param_spec, param_spec, param_spec, param_spec,
            ],
            out_specs=pl.BlockSpec((TB, D), lambda i: (i, 0)),
            compiler_params=pltpu.CompilerParams(
                dimension_semantics=("parallel",)),
        )(obs, self._scale_row, self._bias_row, self._lo_row, self._hi_row)

    # ------------------------- lane-dense path --------------------------------
    def forward_lane_dense(self, obs):
        """Lane-dense variant: view (B, D) as (B*D/128, 128) flat rows.

        Avoids masked partial stores / dead lanes (D=73 < 128).  Requires
        B*D % 128 == 0 and the flat row count divisible by lcm(D,8); falls back
        to the row-tiled path otherwise.  The reshapes here cost a relayout
        copy — in production, feed already-flat buffers from the producer.
        """
        B, D = obs.shape
        assert D == self.D
        tbf = self._flat_tile_rows
        total = B * D
        if total % 128 != 0 or (total // 128) % tbf != 0:
            return self(obs)
        n = total // 128
        x_flat = obs.reshape(n, 128)
        flat_param_spec = pl.BlockSpec((tbf, 128), lambda i: (0, 0))
        out_flat = pl.pallas_call(
            _normalizer_kernel,
            out_shape=jax.ShapeDtypeStruct((n, 128), obs.dtype),
            grid=(n // tbf,),
            in_specs=[
                pl.BlockSpec((tbf, 128), lambda i: (i, 0)),
                flat_param_spec, flat_param_spec,
                flat_param_spec, flat_param_spec,
            ],
            out_specs=pl.BlockSpec((tbf, 128), lambda i: (i, 0)),
            compiler_params=pltpu.CompilerParams(
                dimension_semantics=("parallel",)),
        )(x_flat, self._scale_flat, self._bias_flat,
          self._lo_flat, self._hi_flat)
        return out_flat.reshape(B, D)


# --------------------------- Pure-JAX reference ------------------------------
def reference_forward(obs, num_scan_stack, range_max, n_angles, max_goal_dist,
                      linvel_range, rotvel_range, rpr):
    obs = jnp.asarray(obs, jnp.float32)
    B, D = obs.shape
    scan = obs[:, :-9].reshape(B, num_scan_stack, n_angles)
    scan = jnp.clip(scan, 0.0, range_max) / range_max - 0.5
    out = obs.at[:, :-9].set(scan.reshape(B, -1))
    goal, linvel, rotvel = obs[:, -9], obs[:, -7], obs[:, -6]
    out = out.at[:, -9].set(goal / max_goal_dist - 0.5)
    out = out.at[:, -7].set(
        (linvel - linvel_range[0]) / (linvel_range[1] - linvel_range[0]) - 0.5)
    out = out.at[:, -6].set(
        (rotvel - rotvel_range[0]) / (rotvel_range[1] - rotvel_range[0]) - 0.5)
    crash_lo = rpr['crash'][0][0]
    out = out.at[:, -5].set(
        (obs[:, -5] - rpr['crash'][0][0]) /
        (rpr['crash'][0][1] - rpr['crash'][0][0]) - 0.5)
    for idx, name in zip((-4, -3, -2, -1),
                         ('progress', 'forward', 'rotation', 'discomfort')):
        out = out.at[:, idx].set(
            (obs[:, idx] - rpr[name][0][0]) /
            (rpr[name][0][1] - crash_lo) - 0.5)
    return out


# ---------------------------------- Main --------------------------------------
if __name__ == "__main__":
    num_scan_stack = 4
    n_angles = 16
    range_max = 6.0
    max_goal_dist = 10.0
    linvel_range = (0.0, 1.0)
    rotvel_range = (-1.0, 1.0)
    reward_param_range = {
        'crash': [(-2.0, 0.0)],
        'progress': [(0.0, 1.5)],
        'forward': [(0.0, 1.0)],
        'rotation': [(-0.5, 0.5)],
        'discomfort': [(-1.0, 0.0)],
    }

    norm = LowLevelNormalizerPallas(num_scan_stack, range_max, n_angles,
                                    max_goal_dist, linvel_range, rotvel_range,
                                    reward_param_range)
    D = norm.D  # 4*16 + 9 = 73

    def ref(x):
        return reference_forward(x, num_scan_stack, range_max, n_angles,
                                 max_goal_dist, linvel_range, rotvel_range,
                                 reward_param_range)

    key = jax.random.PRNGKey(0)
    k1, k2 = jax.random.split(key)

    # 1) tiny batch, f32 (single full block)
    obs_small = jax.random.uniform(k1, (2, D), dtype=jnp.float32,
                                   minval=-2.0, maxval=8.0)
    out_small = jax.block_until_ready(norm(obs_small))
    assert out_small.shape == (2, D)
    assert jnp.allclose(out_small, ref(obs_small), atol=1e-5, rtol=1e-5), \
        "rows path (B=2) mismatch vs reference"

    # 2) larger batch: tiled/pipelined rows path + lane-dense path
    obs_big = jax.random.uniform(k2, (8192, D), dtype=jnp.float32,
                                 minval=-2.0, maxval=8.0)
    ref_big = ref(obs_big)
    out_rows = jax.block_until_ready(norm(obs_big))
    assert jnp.allclose(out_rows, ref_big, atol=1e-5, rtol=1e-5), \
        "rows path (B=8192) mismatch vs reference"
    out_flat = jax.block_until_ready(norm.forward_lane_dense(obs_big))
    assert jnp.allclose(out_flat, ref_big, atol=1e-5, rtol=1e-5), \
        "lane-dense path mismatch vs reference"

    # 3) bf16 input: explicit cast on store, f32 compute via promotion
    obs_bf16 = obs_small.astype(jnp.bfloat16)
    out_bf16 = jax.block_until_ready(norm(obs_bf16))
    assert out_bf16.dtype == jnp.bfloat16
    ref_bf16 = ref(obs_bf16.astype(jnp.float32))
    assert jnp.allclose(out_bf16.astype(jnp.float32), ref_bf16,
                        atol=5e-2, rtol=5e-2), "bf16 path mismatch vs reference"

    print("KERNEL_OK")
</pallas_src>

<mosaic_0001>
module attributes {stable_mosaic.version = 11 : i64} {
  func.func @_normalizer_kernel(%arg0: i32, %arg1: memref<2x73xf32, #tpu.memory_space<vmem>>, %arg2: memref<1x73xf32, #tpu.memory_space<vmem>>, %arg3: memref<1x73xf32, #tpu.memory_space<vmem>>, %arg4: memref<1x73xf32, #tpu.memory_space<vmem>>, %arg5: memref<1x73xf32, #tpu.memory_space<vmem>>, %arg6: memref<2x73xf32, #tpu.memory_space<vmem>>) attributes {dimension_semantics = [#tpu.dimension_semantics<parallel>], iteration_bounds = array<i64: 1>, scalar_prefetch = 0 : i64, scratch_operands = 0 : i64, tpu.core_type = #tpu.core_type<tc>, window_params = [{transform_indices = @transform_0, window_bounds = array<i64: 2, 73>}, {pipeline_mode = #tpu.pipeline_mode<synchronous>, transform_indices = @transform_1, window_bounds = array<i64: 1, 73>}, {pipeline_mode = #tpu.pipeline_mode<synchronous>, transform_indices = @transform_2, window_bounds = array<i64: 1, 73>}, {pipeline_mode = #tpu.pipeline_mode<synchronous>, transform_indices = @transform_3, window_bounds = array<i64: 1, 73>}, {pipeline_mode = #tpu.pipeline_mode<synchronous>, transform_indices = @transform_4, window_bounds = array<i64: 1, 73>}, {transform_indices = @transform_5, window_bounds = array<i64: 2, 73>}]} {
    %c0 = arith.constant 0 : index
    %c0_0 = arith.constant 0 : index
    %0 = vector.load %arg1[%c0, %c0_0] : memref<2x73xf32, #tpu.memory_space<vmem>>, vector<2x73xf32>
    %c0_1 = arith.constant 0 : index
    %c0_2 = arith.constant 0 : index
    %1 = vector.load %arg2[%c0_1, %c0_2] : memref<1x73xf32, #tpu.memory_space<vmem>>, vector<1x73xf32>
    %2 = vector.broadcast %1 : vector<1x73xf32> to vector<2x73xf32>
    %3 = arith.mulf %0, %2 : vector<2x73xf32>
    %c0_3 = arith.constant 0 : index
    %c0_4 = arith.constant 0 : index
    %4 = vector.load %arg3[%c0_3, %c0_4] : memref<1x73xf32, #tpu.memory_space<vmem>>, vector<1x73xf32>
    %5 = vector.broadcast %4 : vector<1x73xf32> to vector<2x73xf32>
    %6 = arith.subf %3, %5 : vector<2x73xf32>
    %c0_5 = arith.constant 0 : index
    %c0_6 = arith.constant 0 : index
    %7 = vector.load %arg4[%c0_5, %c0_6] : memref<1x73xf32, #tpu.memory_space<vmem>>, vector<1x73xf32>
    %8 = vector.broadcast %7 : vector<1x73xf32> to vector<2x73xf32>
    %9 = arith.maximumf %6, %8 : vector<2x73xf32>
    %c0_7 = arith.constant 0 : index
    %c0_8 = arith.constant 0 : index
    %10 = vector.load %arg5[%c0_7, %c0_8] : memref<1x73xf32, #tpu.memory_space<vmem>>, vector<1x73xf32>
    %11 = vector.broadcast %10 : vector<1x73xf32> to vector<2x73xf32>
    %12 = arith.minimumf %9, %11 : vector<2x73xf32>
    %c0_9 = arith.constant 0 : index
    %c0_10 = arith.constant 0 : index
    %13 = vector.load %arg6[%c0_9, %c0_10] : memref<2x73xf32, #tpu.memory_space<vmem>>, vector<2x73xf32>
    tpu.vector_store %arg6[%c0_9, %c0_10], %12 {strides = array<i32>} : memref<2x73xf32, #tpu.memory_space<vmem>>, vector<2x73xf32>,
    return
  }
  func.func @transform_0(%arg0: i32) -> (i32, i32) {
    %c0_i32 = arith.constant 0 : i32
    %c0_i32_0 = arith.constant 0 : i32
    return %arg0, %c0_i32 : i32, i32
  }
  func.func @transform_1(%arg0: i32) -> (i32, i32) {
    %c0_i32 = arith.constant 0 : i32
    %c0_i32_0 = arith.constant 0 : i32
    %c0_i32_1 = arith.constant 0 : i32
    return %c0_i32, %c0_i32_0 : i32, i32
  }
  func.func @transform_2(%arg0: i32) -> (i32, i32) {
    %c0_i32 = arith.constant 0 : i32
    %c0_i32_0 = arith.constant 0 : i32
    %c0_i32_1 = arith.constant 0 : i32
    return %c0_i32, %c0_i32_0 : i32, i32
  }
  func.func @transform_3(%arg0: i32) -> (i32, i32) {
    %c0_i32 = arith.constant 0 : i32
    %c0_i32_0 = arith.constant 0 : i32
    %c0_i32_1 = arith.constant 0 : i32
    return %c0_i32, %c0_i32_0 : i32, i32
  }
  func.func @transform_4(%arg0: i32) -> (i32, i32) {
    %c0_i32 = arith.constant 0 : i32
    %c0_i32_0 = arith.constant 0 : i32
    %c0_i32_1 = arith.constant 0 : i32
    return %c0_i32, %c0_i32_0 : i32, i32
  }
  func.func @transform_5(%arg0: i32) -> (i32, i32) {
    %c0_i32 = arith.constant 0 : i32
    %c0_i32_0 = arith.constant 0 : i32
    return %arg0, %c0_i32 : i32, i32
  }
}

</mosaic_0001>

<bundles_post_ra>
// kernel: tpu_custom_call.1
= control target key start
LH: loop header
LB: loop body
LE: loop exit
PB: predicated region body
PF: predicated region fallthrough
CT: control target
= control target key end

     0   :  { %10 = vsyncpa [#allocation3], 0  ;;  %s183_s0 = inlined_call_operand.hbm [shape: f32[2,73], index: 0, kind: input, shape index: {}]   ;;  %s184_s1 = inlined_call_operand.vmem [shape: f32[1,73], index: 1, kind: input, shape index: {}]   ;;  %s185_s2 = inlined_call_operand.vmem [shape: f32[1,73], index: 2, kind: input, shape index: {}]   ;;  %s186_s3 = inlined_call_operand.vmem [shape: f32[1,73], index: 3, kind: input, shape index: {}]   ;;  %s187_s4 = inlined_call_operand.vmem [shape: f32[1,73], index: 4, kind: input, shape index: {}]   ;;  %s188_s5 = inlined_call_operand.hbm [shape: f32[2,73], index: 5, kind: output, shape index: {}]  }
   0x1   :  { %11 = vsyncpa [#allocation4], 0  ;;  %s133_s18 = smov [#allocation2]  }
   0x2   :  { %s18_s19 = sshll.u32 %s133_s18, 4  ;;  %s19_s19 = int_to_ptr.vmem [resolvable:$true] %s18_s19 }
   0x3   :  { %s97_s20 = scalar_lea.vmem %s19_s19, 32  ;;  %p102_p1 = scmp.lt.s32.totalorder %s19_s19, %s19_s19 }
   0x4   :  { %p98_p0 = scmp.ne.s32.totalorder %s19_s19, %s97_s20  ;;  %p103_p2 = scmp.lt.s32.totalorder %s97_s20, %s97_s20 }
   0x6   :  { %p104_p3 = por %p103_p2, %p102_p1 }
   0x8   :  { %p105_p4 = pnand %p104_p3, %p98_p0 }
   0xa   :  { %108 = shalt.err (!%p105_p4)
}
   0xb   :  { %21 = dma.hbm_to_vmem [thread:$0]  %s183_s0, 32, %s19_s19, [#allocation3]  }
   0xc   :  { %129 = dma.done.wait [#allocation3], 32  }
   0xd   :  { %130 = vsyncadd [#allocation3], 4294967264  ;;  %v33_v0 = vld [vmem:[#allocation2] sm:$0x3]  ;;  %s134_s0 = smov [#allocation5]   ;;  %vm66_vm0 = vcmask 590848  }
   0xe   :  { %v83_v1 = vld [vmem:[%s184_s1] ss:$0 sm:$0xff]  ;;  %s74_s6 = sshll.u32 %s134_s0, 4  ;;  %s75_s6 = int_to_ptr.vmem [resolvable:$true] %s74_s6 }
   0xf   :  { %v84_v2 = vld [vmem:[%s185_s2] ss:$0 sm:$0xff]  ;;  %v41_v3 = vmul.f32 %v83_v1, %v33_v0  ;;  %s109_s1 = scalar_lea.vmem %s75_s6, 32  ;;  %p114_p6 = scmp.lt.s32.totalorder %s75_s6, %s75_s6 }
  0x10   :  { %v85_v4 = vld [vmem:[%s186_s3] ss:$0 sm:$0xff]  ;;  %p110_p5 = scmp.ne.s32.totalorder %s75_s6, %s109_s1  ;;  %p115_p7 = scmp.lt.s32.totalorder %s109_s1, %s109_s1 }
  0x11   :  { %v49_v5 = vsub.f32 %v41_v3, %v84_v2  ;;  %v86_v6 = vld [vmem:[%s187_s4] ss:$0 sm:$0xff] }
  0x12   :  { %p116_p8 = por %p115_p7, %p114_p6 }
  0x13   :  { %v57_v7 = vmax.f32 %v49_v5, %v85_v4 }
  0x14   :  { %p117_p9 = pnand %p116_p8, %p110_p5 }
  0x15   :  { %v65_v8 = vmin.f32 %v57_v7, %v86_v6 }
  0x17   :  { %67 = vst.msk [vmem:[#allocation5] sm:$0x3] %vm66_vm0, %v65_v8 }
  0x18   :  { %120 = shalt.err (!%p117_p9)
}
  0x19   :  { %77 = dma.vmem_to_hbm [thread:$0]  %s75_s6, 32, %s188_s5, [#allocation4]  }
  0x1a   :  { %131 = dma.done.wait [#allocation4], 32  }
  0x1b   :  { %132 = vsyncadd [#allocation4], 4294967264 }
  0x1c   :  { %81 = vsyncpa [#allocation3], 1 }
  0x1d   :  { %82 = vsyncpa [#allocation4], 1 }

</bundles_post_ra>
